<compile_context>
chip_gen: v5e
topology: v5e:2x2
jax: 0.10.0
libtpu: 0.0.40
codegen_flags: <defaults>
</compile_context>

<pallas_src>
import jax
import jax.numpy as jnp
import numpy as np
from jax.experimental import pallas as pl
from jax.experimental.pallas import tpu as pltpu

SEQ = 3
HIDDEN = 32
FC1 = 16
FC2 = 8


def _round_up(n, m):
    return ((n + m - 1) // m) * m


def rnn_mlp_kernel(x_ref, wih_ref, whh_ref, brnn_ref,
                   w1_ref, b1_ref, w2_ref, b2_ref, w3_ref, b3_ref,
                   out_ref):
    tb = x_ref.shape[0]

    x = x_ref[...]                      # (TB, SEQ)
    whh = whh_ref[...]                  # (H, H)   == W_hh^T

    # Hoisted constant broadcasts (materialized once, reused every timestep).
    wih_b = jnp.broadcast_to(wih_ref[...], (tb, HIDDEN))    # (TB, H)
    brnn_b = jnp.broadcast_to(brnn_ref[...], (tb, HIDDEN))  # (TB, H), b_ih + b_hh

    # Default h0 = zeros generated in VMEM (not read from HBM).
    h = jnp.zeros((tb, HIDDEN), jnp.float32)
    # fc1 computed as a running accumulator over timesteps instead of concat+matmul.
    acc = jnp.zeros((tb, FC1), jnp.float32)

    for t in range(SEQ):                # static unrolled, SEQ == 3
        pre = x[:, t:t + 1] * wih_b + brnn_b + jnp.dot(
            h, whh, preferred_element_type=jnp.float32)
        h = jnp.tanh(pre)
        # ReLU applies only to the RNN *outputs*; carried state h stays pre-ReLU.
        acc = acc + jnp.dot(jnp.maximum(h, 0.0), w1_ref[t],
                            preferred_element_type=jnp.float32)

    y = acc + b1_ref[...]                                                  # fc1
    y = jnp.dot(y, w2_ref[...], preferred_element_type=jnp.float32) + b2_ref[...]  # fc2
    y = jnp.maximum(y, 0.0)
    y = jnp.dot(y, w3_ref[...], preferred_element_type=jnp.float32) + b3_ref[...]  # fc3
    out_ref[...] = y


def rnn_forward(x, params, *, tile_b=None):
    """x: (B, SEQ, 1) float32. Implements RNN.forward with h0=None (zeros)."""
    B, T, I = x.shape
    assert T == SEQ and I == 1
    x2d = x.reshape(B, T).astype(jnp.float32)

    (w_ih, w_hh, b_ih, b_hh, w1, b1, w2, b2, w3, b3) = params
    wih_t = w_ih.T                                   # (1, 32)
    whh_t = w_hh.T                                   # (32, 32)
    brnn = (b_ih + b_hh)[None, :]                    # (1, 32)
    # fc1 weight pre-split by timestep: rows t*32:(t+1)*32 of W1^T -> (SEQ, 32, 16).
    w1_split = w1.T.reshape(SEQ, HIDDEN, FC1)
    b1r = b1[None, :]                                # (1, 16)
    w2_t, b2r = w2.T, b2[None, :]                    # (16, 8), (1, 8)
    w3_t, b3r = w3.T, b3[None, :]                    # (8, 1),  (1, 1)

    # Batch tiling: multiple of 8 sublanes, capped at 512 rows per tile.
    if tile_b is None:
        tile_b = min(512, _round_up(max(B, 1), 8))
    tile_b = _round_up(tile_b, 8)
    b_padded = _round_up(B, tile_b)
    if b_padded != B:
        x2d = jnp.pad(x2d, ((0, b_padded - B), (0, 0)))
    num_tiles = b_padded // tile_b

    const2d = lambda i: (0, 0)                       # weights stay resident in VMEM
    out = pl.pallas_call(
        rnn_mlp_kernel,
        out_shape=jax.ShapeDtypeStruct((b_padded, 1), jnp.float32),
        grid=(num_tiles,),
        in_specs=[
            pl.BlockSpec((tile_b, SEQ), lambda i: (i, 0)),          # x tile
            pl.BlockSpec((1, HIDDEN), const2d),                     # W_ih^T
            pl.BlockSpec((HIDDEN, HIDDEN), const2d),                # W_hh^T
            pl.BlockSpec((1, HIDDEN), const2d),                     # b_ih + b_hh
            pl.BlockSpec((SEQ, HIDDEN, FC1), lambda i: (0, 0, 0)),  # fc1 W (split)
            pl.BlockSpec((1, FC1), const2d),                        # fc1 b
            pl.BlockSpec((FC1, FC2), const2d),                      # fc2 W^T
            pl.BlockSpec((1, FC2), const2d),                        # fc2 b
            pl.BlockSpec((FC2, 1), const2d),                        # fc3 W^T
            pl.BlockSpec((1, 1), const2d),                          # fc3 b
        ],
        out_specs=pl.BlockSpec((tile_b, 1), lambda i: (i, 0)),
        compiler_params=pltpu.CompilerParams(
            dimension_semantics=("parallel",)),
    )(x2d, wih_t, whh_t, brnn, w1_split, b1r, w2_t, b2r, w3_t, b3r)

    return out[:B]


def init_params(key):
    """Deterministic init matching PyTorch shapes (uniform +/- 1/sqrt(fan_in))."""
    ks = jax.random.split(key, 10)

    def u(k, shape, fan_in):
        lim = 1.0 / np.sqrt(fan_in)
        return jax.random.uniform(k, shape, jnp.float32, -lim, lim)

    w_ih = u(ks[0], (HIDDEN, 1), HIDDEN)         # nn.RNN weight_ih_l0
    w_hh = u(ks[1], (HIDDEN, HIDDEN), HIDDEN)    # nn.RNN weight_hh_l0
    b_ih = u(ks[2], (HIDDEN,), HIDDEN)
    b_hh = u(ks[3], (HIDDEN,), HIDDEN)
    w1 = u(ks[4], (FC1, SEQ * HIDDEN), SEQ * HIDDEN)   # fc1
    b1 = u(ks[5], (FC1,), SEQ * HIDDEN)
    w2 = u(ks[6], (FC2, FC1), FC1)                     # fc2
    b2 = u(ks[7], (FC2,), FC1)
    w3 = u(ks[8], (1, FC2), FC2)                       # fc3
    b3 = u(ks[9], (1,), FC2)
    return (w_ih, w_hh, b_ih, b_hh, w1, b1, w2, b2, w3, b3)


def reference_forward(x, params):
    """Pure-JAX reference implementing the exact PyTorch forward (h0=None)."""
    (w_ih, w_hh, b_ih, b_hh, w1, b1, w2, b2, w3, b3) = params
    B, T, _ = x.shape
    h = jnp.zeros((B, HIDDEN), jnp.float32)
    outs = []
    for t in range(T):
        h = jnp.tanh(x[:, t, :] @ w_ih.T + b_ih + h @ w_hh.T + b_hh)
        outs.append(h)
    o = jnp.stack(outs, axis=1)                 # (B, T, H)
    o = jnp.maximum(o, 0.0)
    o = o.reshape(-1, SEQ * HIDDEN)
    o = o @ w1.T + b1
    o = o @ w2.T + b2
    o = jnp.maximum(o, 0.0)
    o = o @ w3.T + b3
    return o


if __name__ == "__main__":
    key = jax.random.PRNGKey(0)
    kp, kx1, kx2 = jax.random.split(key, 3)
    params = init_params(kp)

    # Small shape consistent with the module: batch 8, seq 3, input size 1.
    B = 8
    x = jax.random.normal(kx1, (B, SEQ, 1), jnp.float32)
    out = jax.block_until_ready(rnn_forward(x, params))
    ref = reference_forward(x, params)
    assert out.shape == (B, 1)
    np.testing.assert_allclose(np.asarray(out), np.asarray(ref), rtol=1e-5, atol=1e-5)

    # Exercise the multi-tile grid + ragged-batch padding path (grid=(3,) at tile 512).
    B2 = 1100
    x2 = jax.random.normal(kx2, (B2, SEQ, 1), jnp.float32)
    out2 = jax.block_until_ready(rnn_forward(x2, params))
    ref2 = reference_forward(x2, params)
    np.testing.assert_allclose(np.asarray(out2), np.asarray(ref2), rtol=1e-5, atol=1e-5)

    print("KERNEL_OK")
</pallas_src>

<mosaic_0001>
module attributes {stable_mosaic.version = 11 : i64} {
  func.func @rnn_mlp_kernel(%arg0: i32, %arg1: memref<8x3xf32, #tpu.memory_space<vmem>>, %arg2: memref<1x32xf32, #tpu.memory_space<vmem>>, %arg3: memref<32x32xf32, #tpu.memory_space<vmem>>, %arg4: memref<1x32xf32, #tpu.memory_space<vmem>>, %arg5: memref<3x32x16xf32, #tpu.memory_space<vmem>>, %arg6: memref<1x16xf32, #tpu.memory_space<vmem>>, %arg7: memref<16x8xf32, #tpu.memory_space<vmem>>, %arg8: memref<1x8xf32, #tpu.memory_space<vmem>>, %arg9: memref<8x1xf32, #tpu.memory_space<vmem>>, %arg10: memref<1x1xf32, #tpu.memory_space<vmem>>, %arg11: memref<8x1xf32, #tpu.memory_space<vmem>>) attributes {dimension_semantics = [#tpu.dimension_semantics<parallel>], iteration_bounds = array<i64: 1>, scalar_prefetch = 0 : i64, scratch_operands = 0 : i64, tpu.core_type = #tpu.core_type<tc>, window_params = [{transform_indices = @transform_0, window_bounds = array<i64: 8, 3>}, {pipeline_mode = #tpu.pipeline_mode<synchronous>, transform_indices = @transform_1, window_bounds = array<i64: 1, 32>}, {pipeline_mode = #tpu.pipeline_mode<synchronous>, transform_indices = @transform_2, window_bounds = array<i64: 32, 32>}, {pipeline_mode = #tpu.pipeline_mode<synchronous>, transform_indices = @transform_3, window_bounds = array<i64: 1, 32>}, {pipeline_mode = #tpu.pipeline_mode<synchronous>, transform_indices = @transform_4, window_bounds = array<i64: 3, 32, 16>}, {pipeline_mode = #tpu.pipeline_mode<synchronous>, transform_indices = @transform_5, window_bounds = array<i64: 1, 16>}, {pipeline_mode = #tpu.pipeline_mode<synchronous>, transform_indices = @transform_6, window_bounds = array<i64: 16, 8>}, {pipeline_mode = #tpu.pipeline_mode<synchronous>, transform_indices = @transform_7, window_bounds = array<i64: 1, 8>}, {pipeline_mode = #tpu.pipeline_mode<synchronous>, transform_indices = @transform_8, window_bounds = array<i64: 8, 1>}, {pipeline_mode = #tpu.pipeline_mode<synchronous>, transform_indices = @transform_9, window_bounds = array<i64: 1, 1>}, {transform_indices = @transform_10, window_bounds = array<i64: 8, 1>}]} {
    %c0 = arith.constant 0 : index
    %c0_0 = arith.constant 0 : index
    %0 = vector.load %arg1[%c0, %c0_0] : memref<8x3xf32, #tpu.memory_space<vmem>>, vector<8x3xf32>
    %c0_1 = arith.constant 0 : index
    %c0_2 = arith.constant 0 : index
    %1 = vector.load %arg3[%c0_1, %c0_2] : memref<32x32xf32, #tpu.memory_space<vmem>>, vector<32x32xf32>
    %c0_3 = arith.constant 0 : index
    %c0_4 = arith.constant 0 : index
    %2 = vector.load %arg2[%c0_3, %c0_4] : memref<1x32xf32, #tpu.memory_space<vmem>>, vector<1x32xf32>
    %3 = vector.shape_cast %2 : vector<1x32xf32> to vector<1x32xf32>
    %4 = vector.broadcast %3 : vector<1x32xf32> to vector<8x32xf32>
    %c0_5 = arith.constant 0 : index
    %c0_6 = arith.constant 0 : index
    %5 = vector.load %arg4[%c0_5, %c0_6] : memref<1x32xf32, #tpu.memory_space<vmem>>, vector<1x32xf32>
    %6 = vector.shape_cast %5 : vector<1x32xf32> to vector<1x32xf32>
    %7 = vector.broadcast %6 : vector<1x32xf32> to vector<8x32xf32>
    %cst = arith.constant 0.000000e+00 : f32
    %8 = vector.broadcast %cst : f32 to vector<8x32xf32>
    %cst_7 = arith.constant 0.000000e+00 : f32
    %9 = vector.broadcast %cst_7 : f32 to vector<8x16xf32>
    %10 = vector.extract_strided_slice %0 {offsets = [0, 0], sizes = [8, 1], strides = [1, 1]} : vector<8x3xf32> to vector<8x1xf32>
    %11 = vector.broadcast %10 : vector<8x1xf32> to vector<8x32xf32>
    %12 = arith.mulf %11, %4 : vector<8x32xf32>
    %13 = arith.addf %12, %7 : vector<8x32xf32>
    %cst_8 = arith.constant dense<0.000000e+00> : vector<8x32xf32>
    %14 = tpu.matmul %8, %1, %cst_8 {dimension_numbers = #tpu.dot_dimension_numbers<[1], [0], [0], [1], [0, 0, 1, 1], [], []>} : vector<8x32xf32>, vector<32x32xf32>, vector<8x32xf32> -> vector<8x32xf32>
    %15 = arith.addf %13, %14 : vector<8x32xf32>
    %16 = math.tanh %15 : vector<8x32xf32>
    %cst_9 = arith.constant 0.000000e+00 : f32
    %17 = vector.broadcast %cst_9 : f32 to vector<8x32xf32>
    %18 = arith.maximumf %16, %17 : vector<8x32xf32>
    %c0_10 = arith.constant 0 : index
    %c0_11 = arith.constant 0 : index
    %c0_12 = arith.constant 0 : index
    %19 = vector.load %arg5[%c0_10, %c0_11, %c0_12] : memref<3x32x16xf32, #tpu.memory_space<vmem>>, vector<1x32x16xf32>
    %20 = vector.shape_cast %19 : vector<1x32x16xf32> to vector<32x16xf32>
    %cst_13 = arith.constant dense<0.000000e+00> : vector<8x16xf32>
    %21 = tpu.matmul %18, %20, %cst_13 {dimension_numbers = #tpu.dot_dimension_numbers<[1], [0], [0], [1], [0, 0, 1, 1], [], []>} : vector<8x32xf32>, vector<32x16xf32>, vector<8x16xf32> -> vector<8x16xf32>
    %22 = arith.addf %9, %21 : vector<8x16xf32>
    %23 = vector.extract_strided_slice %0 {offsets = [0, 1], sizes = [8, 1], strides = [1, 1]} : vector<8x3xf32> to vector<8x1xf32>
    %24 = vector.broadcast %23 : vector<8x1xf32> to vector<8x32xf32>
    %25 = arith.mulf %24, %4 : vector<8x32xf32>
    %26 = arith.addf %25, %7 : vector<8x32xf32>
    %cst_14 = arith.constant dense<0.000000e+00> : vector<8x32xf32>
    %27 = tpu.matmul %16, %1, %cst_14 {dimension_numbers = #tpu.dot_dimension_numbers<[1], [0], [0], [1], [0, 0, 1, 1], [], []>} : vector<8x32xf32>, vector<32x32xf32>, vector<8x32xf32> -> vector<8x32xf32>
    %28 = arith.addf %26, %27 : vector<8x32xf32>
    %29 = math.tanh %28 : vector<8x32xf32>
    %cst_15 = arith.constant 0.000000e+00 : f32
    %30 = vector.broadcast %cst_15 : f32 to vector<8x32xf32>
    %31 = arith.maximumf %29, %30 : vector<8x32xf32>
    %c1 = arith.constant 1 : index
    %c0_16 = arith.constant 0 : index
    %c0_17 = arith.constant 0 : index
    %32 = vector.load %arg5[%c1, %c0_16, %c0_17] : memref<3x32x16xf32, #tpu.memory_space<vmem>>, vector<1x32x16xf32>
    %33 = vector.shape_cast %32 : vector<1x32x16xf32> to vector<32x16xf32>
    %cst_18 = arith.constant dense<0.000000e+00> : vector<8x16xf32>
    %34 = tpu.matmul %31, %33, %cst_18 {dimension_numbers = #tpu.dot_dimension_numbers<[1], [0], [0], [1], [0, 0, 1, 1], [], []>} : vector<8x32xf32>, vector<32x16xf32>, vector<8x16xf32> -> vector<8x16xf32>
    %35 = arith.addf %22, %34 : vector<8x16xf32>
    %36 = vector.extract_strided_slice %0 {offsets = [0, 2], sizes = [8, 1], strides = [1, 1]} : vector<8x3xf32> to vector<8x1xf32>
    %37 = vector.broadcast %36 : vector<8x1xf32> to vector<8x32xf32>
    %38 = arith.mulf %37, %4 : vector<8x32xf32>
    %39 = arith.addf %38, %7 : vector<8x32xf32>
    %cst_19 = arith.constant dense<0.000000e+00> : vector<8x32xf32>
    %40 = tpu.matmul %29, %1, %cst_19 {dimension_numbers = #tpu.dot_dimension_numbers<[1], [0], [0], [1], [0, 0, 1, 1], [], []>} : vector<8x32xf32>, vector<32x32xf32>, vector<8x32xf32> -> vector<8x32xf32>
    %41 = arith.addf %39, %40 : vector<8x32xf32>
    %42 = math.tanh %41 : vector<8x32xf32>
    %cst_20 = arith.constant 0.000000e+00 : f32
    %43 = vector.broadcast %cst_20 : f32 to vector<8x32xf32>
    %44 = arith.maximumf %42, %43 : vector<8x32xf32>
    %c2 = arith.constant 2 : index
    %c0_21 = arith.constant 0 : index
    %c0_22 = arith.constant 0 : index
    %45 = vector.load %arg5[%c2, %c0_21, %c0_22] : memref<3x32x16xf32, #tpu.memory_space<vmem>>, vector<1x32x16xf32>
    %46 = vector.shape_cast %45 : vector<1x32x16xf32> to vector<32x16xf32>
    %cst_23 = arith.constant dense<0.000000e+00> : vector<8x16xf32>
    %47 = tpu.matmul %44, %46, %cst_23 {dimension_numbers = #tpu.dot_dimension_numbers<[1], [0], [0], [1], [0, 0, 1, 1], [], []>} : vector<8x32xf32>, vector<32x16xf32>, vector<8x16xf32> -> vector<8x16xf32>
    %48 = arith.addf %35, %47 : vector<8x16xf32>
    %c0_24 = arith.constant 0 : index
    %c0_25 = arith.constant 0 : index
    %49 = vector.load %arg6[%c0_24, %c0_25] : memref<1x16xf32, #tpu.memory_space<vmem>>, vector<1x16xf32>
    %50 = vector.broadcast %49 : vector<1x16xf32> to vector<8x16xf32>
    %51 = arith.addf %48, %50 : vector<8x16xf32>
    %c0_26 = arith.constant 0 : index
    %c0_27 = arith.constant 0 : index
    %52 = vector.load %arg7[%c0_26, %c0_27] : memref<16x8xf32, #tpu.memory_space<vmem>>, vector<16x8xf32>
    %cst_28 = arith.constant dense<0.000000e+00> : vector<8x8xf32>
    %53 = tpu.matmul %51, %52, %cst_28 {dimension_numbers = #tpu.dot_dimension_numbers<[1], [0], [0], [1], [0, 0, 1, 1], [], []>} : vector<8x16xf32>, vector<16x8xf32>, vector<8x8xf32> -> vector<8x8xf32>
    %c0_29 = arith.constant 0 : index
    %c0_30 = arith.constant 0 : index
    %54 = vector.load %arg8[%c0_29, %c0_30] : memref<1x8xf32, #tpu.memory_space<vmem>>, vector<1x8xf32>
    %55 = vector.broadcast %54 : vector<1x8xf32> to vector<8x8xf32>
    %56 = arith.addf %53, %55 : vector<8x8xf32>
    %cst_31 = arith.constant 0.000000e+00 : f32
    %57 = vector.broadcast %cst_31 : f32 to vector<8x8xf32>
    %58 = arith.maximumf %56, %57 : vector<8x8xf32>
    %c0_32 = arith.constant 0 : index
    %c0_33 = arith.constant 0 : index
    %59 = vector.load %arg9[%c0_32, %c0_33] : memref<8x1xf32, #tpu.memory_space<vmem>>, vector<8x1xf32>
    %cst_34 = arith.constant dense<0.000000e+00> : vector<8x1xf32>
    %60 = tpu.matmul %58, %59, %cst_34 {dimension_numbers = #tpu.dot_dimension_numbers<[1], [0], [0], [1], [0, 0, 1, 1], [], []>} : vector<8x8xf32>, vector<8x1xf32>, vector<8x1xf32> -> vector<8x1xf32>
    %c0_35 = arith.constant 0 : index
    %c0_36 = arith.constant 0 : index
    %61 = vector.load %arg10[%c0_35, %c0_36] : memref<1x1xf32, #tpu.memory_space<vmem>>, vector<1x1xf32>
    %62 = vector.broadcast %61 : vector<1x1xf32> to vector<8x1xf32>
    %63 = arith.addf %60, %62 : vector<8x1xf32>
    %c0_37 = arith.constant 0 : index
    %c0_38 = arith.constant 0 : index
    %64 = vector.load %arg11[%c0_37, %c0_38] : memref<8x1xf32, #tpu.memory_space<vmem>>, vector<8x1xf32>
    tpu.vector_store %arg11[%c0_37, %c0_38], %63 {strides = array<i32>} : memref<8x1xf32, #tpu.memory_space<vmem>>, vector<8x1xf32>,
    return
  }
  func.func @transform_0(%arg0: i32) -> (i32, i32) {
    %c0_i32 = arith.constant 0 : i32
    %c0_i32_0 = arith.constant 0 : i32
    return %arg0, %c0_i32 : i32, i32
  }
  func.func @transform_1(%arg0: i32) -> (i32, i32) {
    %c0_i32 = arith.constant 0 : i32
    %c0_i32_0 = arith.constant 0 : i32
    %c0_i32_1 = arith.constant 0 : i32
    return %c0_i32, %c0_i32_0 : i32, i32
  }
  func.func @transform_2(%arg0: i32) -> (i32, i32) {
    %c0_i32 = arith.constant 0 : i32
    %c0_i32_0 = arith.constant 0 : i32
    %c0_i32_1 = arith.constant 0 : i32
    return %c0_i32, %c0_i32_0 : i32, i32
  }
  func.func @transform_3(%arg0: i32) -> (i32, i32) {
    %c0_i32 = arith.constant 0 : i32
    %c0_i32_0 = arith.constant 0 : i32
    %c0_i32_1 = arith.constant 0 : i32
    return %c0_i32, %c0_i32_0 : i32, i32
  }
  func.func @transform_4(%arg0: i32) -> (i32, i32, i32) {
    %c0_i32 = arith.constant 0 : i32
    %c0_i32_0 = arith.constant 0 : i32
    %c0_i32_1 = arith.constant 0 : i32
    %c0_i32_2 = arith.constant 0 : i32
    return %c0_i32, %c0_i32_0, %c0_i32_1 : i32, i32, i32
  }
  func.func @transform_5(%arg0: i32) -> (i32, i32) {
    %c0_i32 = arith.constant 0 : i32
    %c0_i32_0 = arith.constant 0 : i32
    %c0_i32_1 = arith.constant 0 : i32
    return %c0_i32, %c0_i32_0 : i32, i32
  }
  func.func @transform_6(%arg0: i32) -> (i32, i32) {
    %c0_i32 = arith.constant 0 : i32
    %c0_i32_0 = arith.constant 0 : i32
    %c0_i32_1 = arith.constant 0 : i32
    return %c0_i32, %c0_i32_0 : i32, i32
  }
  func.func @transform_7(%arg0: i32) -> (i32, i32) {
    %c0_i32 = arith.constant 0 : i32
    %c0_i32_0 = arith.constant 0 : i32
    %c0_i32_1 = arith.constant 0 : i32
    return %c0_i32, %c0_i32_0 : i32, i32
  }
  func.func @transform_8(%arg0: i32) -> (i32, i32) {
    %c0_i32 = arith.constant 0 : i32
    %c0_i32_0 = arith.constant 0 : i32
    %c0_i32_1 = arith.constant 0 : i32
    return %c0_i32, %c0_i32_0 : i32, i32
  }
  func.func @transform_9(%arg0: i32) -> (i32, i32) {
    %c0_i32 = arith.constant 0 : i32
    %c0_i32_0 = arith.constant 0 : i32
    %c0_i32_1 = arith.constant 0 : i32
    return %c0_i32, %c0_i32_0 : i32, i32
  }
  func.func @transform_10(%arg0: i32) -> (i32, i32) {
    %c0_i32 = arith.constant 0 : i32
    %c0_i32_0 = arith.constant 0 : i32
    return %arg0, %c0_i32 : i32, i32
  }
}

</mosaic_0001>

<bundles_post_ra>
// kernel: tpu_custom_call.1
= control target key start
LH: loop header
LB: loop body
LE: loop exit
PB: predicated region body
PF: predicated region fallthrough
CT: control target
= control target key end

     0   :  { %v337_v2 = vmov 0   ;;  %v338_v6 = vmov 0.0   ;;  %v339_v11 = vmov 1   ;;  %vm57_vm0 = vcmask 261120   ;;  %s479_s2 = inlined_call_operand.vmem [shape: f32[32,32], index: 2, kind: input, shape index: {}]   ;;  %s480_s0 = inlined_call_operand.vmem [shape: f32[8,3], index: 0, kind: input, shape index: {}]   ;;  %s481_s1 = inlined_call_operand.vmem [shape: f32[1,32], index: 1, kind: input, shape index: {}]   ;;  %s482_s3 = inlined_call_operand.vmem [shape: f32[1,32], index: 3, kind: input, shape index: {}]   ;;  %s483_s4 = inlined_call_operand.vmem [shape: f32[3,32,16], index: 4, kind: input, shape index: {}]   ;;  %s484_s5 = inlined_call_operand.vmem [shape: f32[1,16], index: 5, kind: input, shape index: {}]   ;;  %s485_s6 = inlined_call_operand.vmem [shape: f32[16,8], index: 6, kind: input, shape index: {}]   ;;  %s486_s7 = inlined_call_operand.vmem [shape: f32[1,8], index: 7, kind: input, shape index: {}]   ;;  %s487_s8 = inlined_call_operand.vmem [shape: f32[8,1], index: 8, kind: input, shape index: {}]   ;;  %s488_s9 = inlined_call_operand.<no memory space> [shape: f32[1,1], index: 9, kind: input, shape index: {}]   ;;  %s489_s10 = inlined_call_operand.vmem [shape: f32[8,1], index: 10, kind: output, shape index: {}]  }
   0x1   :  { %v41_v0 = vld [vmem:[%s479_s2 + $0x18] sm:$0xff]  ;;  %v40_v1 = vld [vmem:[%s479_s2 + $0x10] sm:$0xff]  ;;  %322 = vset.pattern.permute.xlu0 %v337_v2  ;;  %v37_v3 = vld [vmem:[%s480_s0] sm:$0xff]  ;;  %v340_v25 = vmov 2   ;;  %vm243_vm1 = vcmask 130048   ;;  %v15_v54 = vstv %s488_s9  ;;  %vm273_vm2 = vcmask 64512  }
   0x2   :  { %73 = vmatpush.msra.mxu0 %v41_v0  ;;  %109 = vmatpush.msra.mxu1 %v41_v0  ;;  %v39_v4 = vld [vmem:[%s479_s2 + $0x8] sm:$0xff]  ;;  %v38_v5 = vld [vmem:[%s479_s2] sm:$0xff]  ;;  %v87_v7 = vld [vmem:[%s483_s4 + $0x18] sm:$0xff]  ;;  %16 = vst [vmem:[#allocation2] sm:$0x1] %v15_v54  ;;  %vm297_vm3 = vcmask 7168  }
   0x3   :  { %52 = vperm.xlu0 %322, %v37_v3   ;;  %v86_v8 = vld [vmem:[%s483_s4 + $0x10] sm:$0xff]  ;;  %163 = vmatpush.msra.mxu3 %v87_v7  ;;  %v85_v9 = vld [vmem:[%s483_s4 + $0x8] sm:$0xff]  ;;  %v84_v10 = vld [vmem:[%s483_s4] sm:$0xff] }
   0x4   :  { %74 = vmatpush.msra.mxu0 %v40_v1  ;;  %110 = vmatpush.msra.mxu1 %v40_v1  ;;  %v326_v12 = vld [vmem:[%s481_s1] ss:$0 sm:$0xff]  ;;  %v307_v21 = vld [vmem:[%s483_s4 + $0x38] sm:$0xff]  ;;  %v306_v22 = vld [vmem:[%s483_s4 + $0x30] sm:$0xff] }
   0x5   :  { %164 = vmatpush.msra.mxu3 %v86_v8  ;;  %v327_v15 = vld [vmem:[%s482_s3] ss:$0 sm:$0xff]  ;;  %140 = vmatpush.msra.mxu2 %v307_v21  ;;  %v305_v23 = vld [vmem:[%s483_s4 + $0x28] sm:$0xff]  ;;  %v314_v33 = vld [vmem:[%s483_s4 + $0x58] sm:$0xff] }
   0x6   :  { %75 = vmatpush.msra.mxu0 %v39_v4  ;;  %111 = vmatpush.msra.mxu1 %v39_v4  ;;  %v304_v24 = vld [vmem:[%s483_s4 + $0x20] sm:$0xff]  ;;  %v313_v34 = vld [vmem:[%s483_s4 + $0x50] sm:$0xff]  ;;  %v312_v35 = vld [vmem:[%s483_s4 + $0x48] sm:$0xff] }
   0x7   :  { %165 = vmatpush.msra.mxu3 %v85_v9  ;;  %141 = vmatpush.msra.mxu2 %v306_v22  ;;  %v311_v36 = vld [vmem:[%s483_s4 + $0x40] sm:$0xff]  ;;  %v238_v37 = vld [vmem:[%s485_s6 + $0x8] sm:$0xff] }
   0x8   :  { %76 = vmatpush.msra.mxu0 %v38_v5  ;;  %112 = vmatpush.msra.mxu1 %v38_v5  ;;  %v237_v45 = vld [vmem:[%s485_s6] sm:$0xff] }
   0x9   :  { %77 = vmatmul.f32.vlgmr.msra.gmra.mxu0 %v338_v6  ;;  %166 = vmatpush.msra.mxu3 %v84_v10  ;;  %v268_v46 = vld [vmem:[%s487_s8] sm:$0xff] }
   0xa   :  { %192 = vmatpush.msrb.mxu0 %v41_v0  ;;  %142 = vmatpush.msra.mxu2 %v305_v23  ;;  %v328_v50 = vld [vmem:[%s484_s5] ss:$0 sm:$0xff] }
   0xb   :  { %323 = vset.pattern.permute.xlu0 %v339_v11  ;;  %324 = vset.pattern.permute.xlu1 %v340_v25  ;;  %v329_v55 = vld [vmem:[%s486_s7] ss:$0 sm:$0xff] }
   0xc   :  { %193 = vmatpush.msrb.mxu0 %v40_v1  ;;  %89 = vperm.xlu0 %323, %v37_v3   ;;  %v330_v59 = vld [vmem:[#allocation2] ss:$0 sm:$0xff] }
   0xd   :  { %143 = vmatpush.msra.mxu2 %v304_v24  ;;  %172 = vperm.xlu1 %324, %v37_v3  }
   0xe   :  { %194 = vmatpush.msrb.mxu0 %v39_v4  ;;  %223 = vmatpush.msrb.mxu1 %v314_v33 }
   0xf   :  { %261 = vmatpush.msrb.mxu2 %v238_v37  ;;  %292 = vmatpush.msrb.mxu3 %v268_v46 }
  0x10   :  { %195 = vmatpush.msrb.mxu0 %v38_v5  ;;  %224 = vmatpush.msrb.mxu1 %v313_v34 }
  0x11   :  { %262 = vmatpush.msrb.mxu2 %v237_v45 }
  0x12   :  { %225 = vmatpush.msrb.mxu1 %v312_v35 }
  0x14   :  { %325 = vset.pattern.permute.xlu0 %v340_v25  ;;  %226 = vmatpush.msrb.mxu1 %v311_v36 }
  0x75   :  { %v53_v13 = vpop.permute.xlu0 %52 }
  0x76   :  { %v55_v14 = vmul.f32 %v326_v12, %v53_v13 }
  0x78   :  { %v56_v16 = vadd.f32 %v327_v15, %v55_v14 }
  0x7e   :  { %v90_v26 = vpop.permute.xlu0 %89 }
  0x7f   :  { %v92_v27 = vmul.f32 %v326_v12, %v90_v26  ;;  %v173_v38 = vpop.permute.xlu1 %172 }
  0x80   :  { %v175_v39 = vmul.f32 %v326_v12, %v173_v38 }
  0x81   :  { %v93_v28 = vadd.f32 %v327_v15, %v92_v27 }
  0x82   :  { %v176_v40 = vadd.f32 %v327_v15, %v175_v39 }
  0x86   :  { %v78_v17 = vpop.f32.mrf.mxu0 }
  0x87   :  { %v81_v18 = vadd.f32 %v78_v17, %v56_v16 }
  0x89   :  { %331 = vtanh.f32 %v81_v18 }
  0x8f   :  { %v332_v19 = vpop.eup %331 }
  0x90   :  { %303 = vmatmul.msk.f32.vlgmr.msra.gmra.mxu1 %vm57_vm0, %v332_v19  ;;  %v83_v20 = vmax.f32 %v332_v19, 0.0 }
  0x92   :  { %309 = vmatmul.msk.f32.vlgmr.msra.gmra.mxu3 %vm57_vm0, %v83_v20 }
 0x10d   :  { %v114_v29 = vpop.f32.mrf.mxu1 }
 0x10e   :  { %v117_v30 = vadd.f32 %v114_v29, %v93_v28 }
 0x110   :  { %333 = vtanh.f32 %v117_v30 }
 0x115   :  { %v168_v48 = vpop.f32.mrf.mxu3 }
 0x116   :  { %v334_v31 = vpop.eup %333 }
 0x117   :  { %310 = vmatmul.msk.f32.vlgmr.msrb.gmra.mxu0 %vm57_vm0, %v334_v31  ;;  %v119_v32 = vmax.f32 %v334_v31, 0.0 }
 0x119   :  { %308 = vmatmul.msk.f32.vlgmr.msra.gmra.mxu2 %vm57_vm0, %v119_v32 }
 0x194   :  { %v197_v41 = vpop.f32.mrf.mxu0 }
 0x195   :  { %v200_v42 = vadd.f32 %v197_v41, %v176_v40 }
 0x197   :  { %335 = vtanh.f32 %v200_v42 }
 0x19c   :  { %v145_v47 = vpop.f32.mrf.mxu2 }
 0x19d   :  { %v336_v43 = vpop.eup %335  ;;  %v169_v49 = vadd.f32 %v168_v48, %v145_v47 }
 0x19e   :  { %v202_v44 = vmax.f32 %v336_v43, 0.0 }
 0x1a0   :  { %315 = vmatmul.msk.f32.vlgmr.msrb.gmra.mxu1 %vm57_vm0, %v202_v44 }
 0x21d   :  { %v228_v51 = vpop.f32.mrf.mxu1 }
 0x21e   :  { %v231_v52 = vadd.f32 %v228_v51, %v169_v49 }
 0x220   :  { %v236_v53 = vadd.f32 %v328_v50, %v231_v52 }
 0x222   :  { %316 = vmatmul.msk.f32.vlgmr.msrb.gmra.mxu2 %vm243_vm1, %v236_v53 }
 0x2a5   :  { %v264_v56 = vpop.f32.mrf.mxu2 }
 0x2a6   :  { %v265_v57 = vadd.f32 %v329_v55, %v264_v56 }
 0x2a8   :  { %v267_v58 = vmax.f32 %v265_v57, 0.0 }
 0x2aa   :  { %317 = vmatmul.msk.f32.vlgmr.msrb.gmra.mxu3 %vm273_vm2, %v267_v58 }
 0x32d   :  { %v294_v60 = vpop.f32.mrf.mxu3 }
 0x32e   :  { %v295_v61 = vadd.f32 %v330_v59, %v294_v60 }
 0x330   :  { %298 = vst.msk [vmem:[%s489_s10] sm:$0xff] %vm297_vm3, %v295_v61 }

</bundles_post_ra>
